<compile_context>
chip_gen: v5e
topology: v5e:2x2
jax: 0.10.0
libtpu: 0.0.40
codegen_flags: <defaults>
</compile_context>

<pallas_src>
import functools

import jax
import jax.numpy as jnp
from jax.experimental import pallas as pl
from jax.experimental.pallas import tpu as pltpu


def _xw_kernel(x_ref, w_ref, xw_ref):
    # x_ref: (tm, F_in) f32, w_ref: (F_in, F_pad) f32, xw_ref: (tm, F_pad) bf16
    xw_ref[...] = jnp.dot(
        x_ref[...], w_ref[...], preferred_element_type=jnp.float32
    ).astype(xw_ref.dtype)


def _agg_kernel_resident(a_ref, xw_ref, b_ref, o_ref, *, tk):
    # a_ref : (tm, tk)    adjacency tile (f32 or bf16); cast to bf16 in-kernel
    # xw_ref: (N, F_pad)  bf16, whole X@W resident in VMEM (fetched once)
    # b_ref : (1, F_pad)  f32 bias (zero-padded)
    # o_ref : (tm, F_pad) f32 resident output tile; doubles as the accumulator
    k = pl.program_id(1)

    @pl.when(k == 0)
    def _():
        o_ref[...] = jnp.broadcast_to(b_ref[...], o_ref.shape)

    start = pl.multiple_of(k * tk, tk)
    o_ref[...] += jnp.dot(
        a_ref[...].astype(jnp.bfloat16),
        xw_ref[pl.ds(start, tk), :],
        preferred_element_type=jnp.float32,
    )


def _agg_kernel_tiled(a_ref, xw_ref, b_ref, o_ref):
    # Fallback when XW does not fit VMEM: xw_ref is the (tk, F_pad) slice for this k.
    k = pl.program_id(1)

    @pl.when(k == 0)
    def _():
        o_ref[...] = jnp.broadcast_to(b_ref[...], o_ref.shape)

    o_ref[...] += jnp.dot(
        a_ref[...].astype(jnp.bfloat16),
        xw_ref[...],
        preferred_element_type=jnp.float32,
    )


def gcn_encoder_forward(a_hat, x, w, b, *, tm=512, tk=2048):
    """out = A_hat @ (X @ W) + b   (GraphConv forward on a dense normalized adjacency).

    A_hat is streamed in the caller's dtype (pass bf16 to halve adjacency HBM traffic);
    no extra cast pass is performed over it here.
    """
    N = a_hat.shape[0]
    f_in = x.shape[1]
    f_out = w.shape[1]
    f_pad = ((f_out + 127) // 128) * 128  # lane-dense output width

    tm = min(tm, N)
    tk = min(tk, N)
    # Prefer >= 2 node tiles so both v7x TensorCores get work (no effect on v5e/v6e).
    if N // tm < 2 and N % 2 == 0 and (N // 2) % 8 == 0:
        tm = N // 2
    assert N % tm == 0 and N % tk == 0, "N must be divisible by the tile sizes"

    # Zero-pad weight / bias so the output (and the resident XW operand) is 128-wide.
    w_pad = jnp.zeros((f_in, f_pad), jnp.float32).at[:, :f_out].set(
        w.astype(jnp.float32))
    b_pad = jnp.zeros((1, f_pad), jnp.float32).at[:, :f_out].set(
        jnp.reshape(b, (1, f_out)).astype(jnp.float32))

    # ---- Stage 1: XW = X @ W, computed once, stored as bf16 (N, F_pad). ----
    xw = pl.pallas_call(
        _xw_kernel,
        out_shape=jax.ShapeDtypeStruct((N, f_pad), jnp.bfloat16),
        grid_spec=pltpu.PrefetchScalarGridSpec(
            num_scalar_prefetch=0,
            grid=(N // tm,),
            in_specs=[
                pl.BlockSpec((tm, f_in), lambda i: (i, 0)),     # X row tile
                pl.BlockSpec((f_in, f_pad), lambda i: (0, 0)),  # W (whole, padded)
            ],
            out_specs=pl.BlockSpec((tm, f_pad), lambda i: (i, 0)),
        ),
        compiler_params=pltpu.CompilerParams(
            dimension_semantics=("parallel",)),
    )(x.astype(jnp.float32), w_pad)

    # ---- Stage 2: out = A_hat @ XW + b, K-tiled, accumulate directly into o_ref. ----
    grid = (N // tm, N // tk)
    a_itemsize = jnp.dtype(a_hat.dtype).itemsize

    # Deeper buffering on the bandwidth-dominant A_hat stream only for large grids
    # (never triggered at demo shapes).
    deep_a = grid[0] * grid[1] >= 8
    a_bufs = 3 if deep_a else 2

    # XW residency: whole (N, F_pad) bf16 array kept in VMEM when it fits.
    xw_resident = N * f_pad * 2 <= 16 * 1024 * 1024
    xw_vmem = N * f_pad * 2 if xw_resident else 2 * tk * f_pad * 2

    # Explicit per-config VMEM budget (v7x has only 64 MiB physical VMEM).
    vmem_needed = (a_bufs * tm * tk * a_itemsize        # A_hat tiles
                   + xw_vmem                            # resident or double-buffered XW
                   + 2 * tm * f_pad * 4                 # f32 output tile (double-buffered)
                   + 2 * 8 * f_pad * 4)                 # bias (sublane-padded)
    vmem_limit = max(vmem_needed + 8 * 1024 * 1024, 16 * 1024 * 1024)
    vmem_limit = min(vmem_limit, 40 * 1024 * 1024)      # keep headroom on v7x
    vmem_limit = max(vmem_limit, vmem_needed + 2 * 1024 * 1024)

    a_spec_kwargs = {"pipeline_mode": pl.Buffered(3)} if deep_a else {}
    a_spec = pl.BlockSpec((tm, tk), lambda i, k: (i, k), **a_spec_kwargs)

    if xw_resident:
        agg_kernel = functools.partial(_agg_kernel_resident, tk=tk)
        xw_spec = pl.BlockSpec((N, f_pad), lambda i, k: (0, 0))   # fetched once, stays
    else:
        agg_kernel = _agg_kernel_tiled
        xw_spec = pl.BlockSpec((tk, f_pad), lambda i, k: (k, 0))

    out_pad = pl.pallas_call(
        agg_kernel,
        out_shape=jax.ShapeDtypeStruct((N, f_pad), jnp.float32),
        grid_spec=pltpu.PrefetchScalarGridSpec(
            num_scalar_prefetch=0,
            grid=grid,
            in_specs=[
                a_spec,                                            # A_hat tile
                xw_spec,                                           # X @ W
                pl.BlockSpec((1, f_pad), lambda i, k: (0, 0)),     # bias (resident)
            ],
            out_specs=pl.BlockSpec((tm, f_pad), lambda i, k: (i, 0)),
        ),
        compiler_params=pltpu.CompilerParams(
            dimension_semantics=("parallel", "arbitrary"),
            vmem_limit_bytes=int(vmem_limit)),
    )(a_hat, xw, b_pad)

    return out_pad[:, :f_out]


def build_normalized_adjacency(key, n_nodes, p_edge=0.1, dtype=jnp.bfloat16):
    """Dense symmetric random graph with self-loops, D^{-1/2} A D^{-1/2}.

    Returned directly in `dtype` (bf16 by default) so the GCN kernel streams it
    without an extra cast pass over HBM.
    """
    rnd = jax.random.uniform(key, (n_nodes, n_nodes))
    adj = (rnd < p_edge).astype(jnp.float32)
    adj = jnp.maximum(adj, adj.T)                      # undirected
    adj = jnp.maximum(adj, jnp.eye(n_nodes))           # self-loops (no zero degree)
    deg = adj.sum(axis=1)
    d_inv_sqrt = 1.0 / jnp.sqrt(deg)
    return (adj * d_inv_sqrt[:, None] * d_inv_sqrt[None, :]).astype(dtype)


if __name__ == "__main__":
    # Small shapes: N=256 nodes, in_feats=32, out_feats=16.
    N, IN_FEATS, OUT_FEATS = 256, 32, 16

    key = jax.random.PRNGKey(0)
    k_adj, k_x, k_w = jax.random.split(key, 3)

    a_hat = build_normalized_adjacency(k_adj, N)       # bf16 end-to-end
    x = jax.random.normal(k_x, (N, IN_FEATS), dtype=jnp.float32)

    # Deterministic GraphConv parameter init (Glorot-like for W, zeros for b).
    w = jax.random.normal(k_w, (IN_FEATS, OUT_FEATS), dtype=jnp.float32) * (
        1.0 / jnp.sqrt(jnp.float32(IN_FEATS)))
    b = jnp.zeros((1, OUT_FEATS), dtype=jnp.float32)

    # tm=tk=128 at N=256 exercises a 2x2 grid (bias init at k==0, k-accumulation path,
    # resident-XW slicing) on both TensorCores.
    out = gcn_encoder_forward(a_hat, x, w, b, tm=128, tk=128)
    out = jax.block_until_ready(out)

    # Reference check in plain JAX (f32); bf16 A_hat / XW -> loose tolerance.
    ref = a_hat.astype(jnp.float32) @ (x @ w) + b
    assert out.shape == (N, OUT_FEATS)
    assert jnp.allclose(out, ref, atol=1e-2, rtol=1e-2), float(
        jnp.max(jnp.abs(out - ref)))

    print("KERNEL_OK")
</pallas_src>

<mosaic_0001>
module attributes {stable_mosaic.version = 11 : i64} {
  func.func @_xw_kernel(%arg0: i32, %arg1: memref<128x32xf32, #tpu.memory_space<vmem>>, %arg2: memref<32x128xf32, #tpu.memory_space<vmem>>, %arg3: memref<128x128xbf16, #tpu.memory_space<vmem>>) attributes {dimension_semantics = [#tpu.dimension_semantics<parallel>], iteration_bounds = array<i64: 2>, scalar_prefetch = 0 : i64, scratch_operands = 0 : i64, tpu.core_type = #tpu.core_type<tc>, window_params = [{transform_indices = @transform_0, window_bounds = array<i64: 128, 32>}, {pipeline_mode = #tpu.pipeline_mode<synchronous>, transform_indices = @transform_1, window_bounds = array<i64: 32, 128>}, {transform_indices = @transform_2, window_bounds = array<i64: 128, 128>}]} {
    %c0 = arith.constant 0 : index
    %c0_0 = arith.constant 0 : index
    %0 = vector.load %arg1[%c0, %c0_0] : memref<128x32xf32, #tpu.memory_space<vmem>>, vector<128x32xf32>
    %c0_1 = arith.constant 0 : index
    %c0_2 = arith.constant 0 : index
    %1 = vector.load %arg2[%c0_1, %c0_2] : memref<32x128xf32, #tpu.memory_space<vmem>>, vector<32x128xf32>
    %cst = arith.constant dense<0.000000e+00> : vector<128x128xf32>
    %2 = tpu.matmul %0, %1, %cst {dimension_numbers = #tpu.dot_dimension_numbers<[1], [0], [0], [1], [0, 0, 1, 1], [], []>} : vector<128x32xf32>, vector<32x128xf32>, vector<128x128xf32> -> vector<128x128xf32>
    %3 = arith.truncf %2 : vector<128x128xf32> to vector<128x128xbf16>
    %c0_3 = arith.constant 0 : index
    %c0_4 = arith.constant 0 : index
    %4 = vector.load %arg3[%c0_3, %c0_4] : memref<128x128xbf16, #tpu.memory_space<vmem>>, vector<128x128xbf16>
    tpu.vector_store %arg3[%c0_3, %c0_4], %3 {strides = array<i32>} : memref<128x128xbf16, #tpu.memory_space<vmem>>, vector<128x128xbf16>,
    return
  }
  func.func @transform_0(%arg0: i32) -> (i32, i32) {
    %c0_i32 = arith.constant 0 : i32
    %c0_i32_0 = arith.constant 0 : i32
    return %arg0, %c0_i32 : i32, i32
  }
  func.func @transform_1(%arg0: i32) -> (i32, i32) {
    %c0_i32 = arith.constant 0 : i32
    %c0_i32_0 = arith.constant 0 : i32
    %c0_i32_1 = arith.constant 0 : i32
    return %c0_i32, %c0_i32_0 : i32, i32
  }
  func.func @transform_2(%arg0: i32) -> (i32, i32) {
    %c0_i32 = arith.constant 0 : i32
    %c0_i32_0 = arith.constant 0 : i32
    return %arg0, %c0_i32 : i32, i32
  }
}

</mosaic_0001>

<bundles_post_ra>
// kernel: tpu_custom_call.1
= control target key start
LH: loop header
LB: loop body
LE: loop exit
PB: predicated region body
PF: predicated region fallthrough
CT: control target
= control target key end

     0   :  { %7 = vsyncpa [#allocation3], 0  ;;  %s733_s0 = inlined_call_operand.vmem [shape: f32[256,32], index: 0, kind: input, shape index: {}]   ;;  %s734_s1 = inlined_call_operand.vmem [shape: f32[32,128], index: 1, kind: input, shape index: {}]   ;;  %s735_s2 = inlined_call_operand.hbm [shape: bf16[256,128], index: 2, kind: output, shape index: {}]  }
   0x1   :  { %9 = vsyncpa [#allocation3 + $0x1], 0  ;;  %s599_s9 = smov 0   ;;  %s601_s10 = smov 0  }
   0x2   :  { %s603_s11 = smov 0   ;;  %s605_s12 = smov 0  }
   0x3 LB: > { %s620_s13 = sadd.s32 4294967295, %s580_s12   ;;  %s389_s14 = sadd.s32 4294967294, %s580_s12   ;;  %s580_s12 = sphi %s605_s12, %s741_s12   ;;  %s576_s11 = sphi %s603_s11, %s740_s11   ;;  %s572_s10 = sphi %s601_s10, %s739_s10   ;;  %s568_s9 = sphi %s599_s9, %s738_s9  }
   0x4   : > { %s624_s15 = sadd.s32 1, %s580_s12   ;;  %s69_s16 = sadd.s32 1, %s576_s11 }
   0x5   : > { %s66_s17 = ssub.s32 %s580_s12, %s624_s15  ;;  %p79_p0 = scmp.ne.s32.totalorder %s576_s11, %s572_s10 }
   0x6   : > { %p67_p1 = scmp.eq.s32.totalorder %s66_s17, 0  ;;  %p80_p2 = scmp.eq.s32.totalorder %s620_s13, 1 }
   0x7   : > { %p85_p3 = scmp.ne.s32.totalorder %s572_s10, %s568_s9  ;;  %p86_p4 = scmp.eq.s32.totalorder %s389_s14, 1 }
   0x8   : > { %s635_s18 = scalar_select %p67_p1, %s576_s11, %s69_s16  }
   0x9   : > { %p637_p5 = por %p80_p2, %p79_p0  ;;  %p641_p6 = por %p86_p4, %p85_p3 }
   0xa   : > { %p392_p7 = scmp.ge.s32.totalorder %s580_s12, 1  ;;  %p116_p8 = scmp.lt.s32.totalorder %s580_s12, 3 }
   0xc   : > { %p117_p9 = pnand %p392_p7, %p116_p8 }
   0xd   : > { %s394_s25 = sshll.u32 (!%p117_p9), %s620_s13, 4  ;;  %s135_s6 = sand.u32 (!%p117_p9), 1, %s572_s10  }
   0xe   : > { %120 = sbr.rel (%p117_p9) target bundleno = 192 (0xc0), region = 28  ;;  %p139_p10 = scmp.lt.s32.totalorder (!%p117_p9), %s394_s25, 31 }
   0xf   : > { %s393_s7 = sshll.u32 (!%p117_p9), %s135_s6, 6  ;;  %s417_s14 = sshll.u32 (!%p117_p9), %s620_s13, 6 }
  0x10   : > { %s137_s8 = scalar_lea.vmem (!%p117_p9), [#allocation2], %s393_s7  ;;  %s323_s21 = scalar_lea.hbm (!%p117_p9), %s735_s2, %s417_s14 }
  0x11   : > { %s324_s22 = sshll.u32 (!%p117_p9), %s137_s8, 4  ;;  %s326_s23 = sshll.u32 (!%p117_p9), %s323_s21, 4  ;;  %s325_s22 = int_to_ptr.vmem [resolvable:$true] %s324_s22  ;;  %s327_s23 = int_to_ptr.hbm [resolvable:$true] %s326_s23 }
  0x12   : > { %s312_s13 = scalar_lea.sflag (!%p117_p9), [#allocation3], %s135_s6  ;;  %s532_s24 = sshra.s32 (!%p117_p9), %s327_s23, 4  ;;  %s533_s24 = int_to_ptr.hbm [resolvable:$true] %s532_s24 }
  0x13   : > { %v164_v0 = vld [vmem:[%s734_s1 + $0x18] sm:$0xff]  ;;  %v163_v1 = vld [vmem:[%s734_s1 + $0x10] sm:$0xff]  ;;  %v162_v2 = vld [vmem:[%s734_s1 + $0x8] sm:$0xff]  ;;  %s743_s25 = smov (!%p139_p10, %s394_s25), 31  ;;  %vm165_vm0 = vcmask 261120   ;;  %s538_s28 = scalar_lea.hbm %s735_s2, 128 }
  0x14   : > { %226 = vmatpush.msra.mxu0 %v164_v0  ;;  %465 = vmatpush.msra.mxu1 %v164_v0  ;;  %v161_v3 = vld [vmem:[%s734_s1] sm:$0xff]  ;;  %s395_s30 = sshll.u32 %s743_s25, 3  ;;  %s534_s25 = scalar_lea.hbm %s533_s24, 64 }
  0x15   : > { %466 = vmatpush.msra.mxu2 %v164_v0  ;;  %467 = vmatpush.msra.mxu3 %v164_v0  ;;  %s663_s5 = scalar_lea.vmem %s733_s0, %s395_s30  ;;  %p535_p11 = scmp.ne.s32.totalorder %s533_s24, %s534_s25 }
  0x16   : > { %227 = vmatpush.msra.mxu0 %v163_v1  ;;  %468 = vmatpush.msra.mxu1 %v163_v1  ;;  %v145_v4 = vld [vmem:[%s663_s5] sm:$0xff]  ;;  %v146_v8 = vld [vmem:[%s663_s5 + $0x8] sm:$0xff]  ;;  %v147_v12 = vld [vmem:[%s663_s5 + $0x10] sm:$0xff]  ;;  %p539_p0 = scmp.lt.s32.totalorder %s533_s24, %s735_s2  ;;  %p540_p1 = scmp.lt.s32.totalorder %s538_s28, %s534_s25 }
  0x17   : > { %469 = vmatpush.msra.mxu2 %v163_v1  ;;  %470 = vmatpush.msra.mxu3 %v163_v1  ;;  %v149_v5 = vld [vmem:[%s663_s5 + $0x20] sm:$0xff]  ;;  %v150_v9 = vld [vmem:[%s663_s5 + $0x28] sm:$0xff]  ;;  %v151_v13 = vld [vmem:[%s663_s5 + $0x30] sm:$0xff]  ;;  %p536_p12 = pnand %p535_p11, %p637_p5 }
  0x18   : > { %228 = vmatpush.msra.mxu0 %v162_v2  ;;  %471 = vmatpush.msra.mxu1 %v162_v2  ;;  %v153_v6 = vld [vmem:[%s663_s5 + $0x40] sm:$0xff]  ;;  %v154_v10 = vld [vmem:[%s663_s5 + $0x48] sm:$0xff]  ;;  %v155_v14 = vld [vmem:[%s663_s5 + $0x50] sm:$0xff]  ;;  %p541_p2 = por %p540_p1, %p539_p0 }
  0x19   : > { %472 = vmatpush.msra.mxu2 %v162_v2  ;;  %473 = vmatpush.msra.mxu3 %v162_v2  ;;  %v157_v7 = vld [vmem:[%s663_s5 + $0x60] sm:$0xff]  ;;  %v158_v11 = vld [vmem:[%s663_s5 + $0x68] sm:$0xff]  ;;  %v159_v15 = vld [vmem:[%s663_s5 + $0x70] sm:$0xff]  ;;  %p537_p13 = pneg %p536_p12 }
  0x1a   : > { %229 = vmatpush.msra.mxu0 %v161_v3  ;;  %474 = vmatpush.msra.mxu1 %v161_v3  ;;  %v148_v16 = vld [vmem:[%s663_s5 + $0x18] sm:$0xff] }
  0x1b   : > { %475 = vmatpush.msra.mxu2 %v161_v3  ;;  %476 = vmatpush.msra.mxu3 %v161_v3  ;;  %v152_v17 = vld [vmem:[%s663_s5 + $0x38] sm:$0xff]  ;;  %p542_p3 = pnand %p541_p2, %p537_p13 }
  0x1c   : > { %396 = vmatmul.msk.f32.vlgmr.msra.gmra.mxu0 %vm165_vm0, %v145_v4  ;;  %400 = vmatmul.msk.f32.vlgmr.msra.gmra.mxu1 %vm165_vm0, %v149_v5  ;;  %v156_v18 = vld [vmem:[%s663_s5 + $0x58] sm:$0xff] }
  0x1d   : > { %404 = vmatmul.msk.f32.vlgmr.msra.gmra.mxu2 %vm165_vm0, %v153_v6  ;;  %408 = vmatmul.msk.f32.vlgmr.msra.gmra.mxu3 %vm165_vm0, %v157_v7  ;;  %v160_v19 = vld [vmem:[%s663_s5 + $0x78] sm:$0xff] }
  0x24   : > { %397 = vmatmul.msk.f32.gmra.mxu0 %vm165_vm0, %v146_v8  ;;  %401 = vmatmul.msk.f32.gmra.mxu1 %vm165_vm0, %v150_v9 }
  0x25   : > { %405 = vmatmul.msk.f32.gmra.mxu2 %vm165_vm0, %v154_v10  ;;  %409 = vmatmul.msk.f32.gmra.mxu3 %vm165_vm0, %v158_v11 }
  0x2c   : > { %398 = vmatmul.msk.f32.gmra.mxu0 %vm165_vm0, %v147_v12  ;;  %402 = vmatmul.msk.f32.gmra.mxu1 %vm165_vm0, %v151_v13 }
  0x2d   : > { %406 = vmatmul.msk.f32.gmra.mxu2 %vm165_vm0, %v155_v14  ;;  %410 = vmatmul.msk.f32.gmra.mxu3 %vm165_vm0, %v159_v15 }
  0x34   : > { %399 = vmatmul.msk.f32.gmra.mxu0 %vm165_vm0, %v148_v16  ;;  %403 = vmatmul.msk.f32.gmra.mxu1 %vm165_vm0, %v152_v17 }
  0x35   : > { %407 = vmatmul.msk.f32.gmra.mxu2 %vm165_vm0, %v156_v18  ;;  %411 = vmatmul.msk.f32.gmra.mxu3 %vm165_vm0, %v160_v19 }
  0x99   : > { %v231_v20 = vpop.f32.mrf.mxu0  ;;  %v243_v21 = vpop.f32.mrf.mxu1 }
  0xa0   : > { %v255_v22 = vpop.f32.mrf.mxu2  ;;  %v267_v23 = vpop.f32.mrf.mxu3 }
  0xa1   : > { %v234_v24 = vpop.f32.mrf.mxu0  ;;  %v246_v25 = vpop.f32.mrf.mxu1 }
  0xa2   : > { %v421_v26 = vpack.c.bf16 %v234_v24, %v231_v20  ;;  %v431_v27 = vpack.c.bf16 %v246_v25, %v243_v21 }
  0xa4   : > { %422 = vst [vmem:[%s137_s8] sm:$0xff] %v421_v26  }
  0xa5   : > { %459 = vst [vmem:[%s137_s8 + $0x10] sm:$0xff] %v431_v27  }
  0xa8   : > { %v258_v28 = vpop.f32.mrf.mxu2  ;;  %v270_v29 = vpop.f32.mrf.mxu3 }
  0xa9   : > { %v441_v30 = vpack.c.bf16 %v258_v28, %v255_v22  ;;  %v451_v31 = vpack.c.bf16 %v270_v29, %v267_v23  ;;  %v237_v32 = vpop.f32.mrf.mxu0  ;;  %v249_v33 = vpop.f32.mrf.mxu1 }
  0xab   : > { %461 = vst [vmem:[%s137_s8 + $0x20] sm:$0xff] %v441_v30  }
  0xac   : > { %463 = vst [vmem:[%s137_s8 + $0x30] sm:$0xff] %v451_v31  }
  0xb0   : > { %v261_v34 = vpop.f32.mrf.mxu2  ;;  %v273_v35 = vpop.f32.mrf.mxu3 }
  0xb1   : > { %v240_v36 = vpop.f32.mrf.mxu0  ;;  %v252_v37 = vpop.f32.mrf.mxu1 }
  0xb2   : > { %v426_v38 = vpack.c.bf16 %v240_v36, %v237_v32  ;;  %v436_v39 = vpack.c.bf16 %v252_v37, %v249_v33 }
  0xb4   : > { %458 = vst [vmem:[%s137_s8 + $0x8] sm:$0xff] %v426_v38  }
  0xb5   : > { %460 = vst [vmem:[%s137_s8 + $0x18] sm:$0xff] %v436_v39  }
  0xb8   : > { %v264_v40 = vpop.f32.mrf.mxu2  ;;  %v276_v41 = vpop.f32.mrf.mxu3 }
  0xb9   : > { %v446_v42 = vpack.c.bf16 %v264_v40, %v261_v34  ;;  %v456_v43 = vpack.c.bf16 %v276_v41, %v273_v35 }
  0xbb   : > { %462 = vst [vmem:[%s137_s8 + $0x28] sm:$0xff] %v446_v42  }
  0xbc   : > { %464 = vst [vmem:[%s137_s8 + $0x38] sm:$0xff] %v456_v43  }
  0xbd   : > { %545 = shalt.err (!%p542_p3)
}
  0xbe   : > { %s582_s3 = smov 64   ;;  %s583_s4 = smov 4  }
  0xbf   : > { %477 = dma.vmem_to_hbm [thread:$0]  (%p637_p5), %s325_s22, 1024, %s327_s23, %s312_s13, %s582_s3, %s582_s3, %s583_s4  }
  0xc0 PF: > { %p483_p4 = scmp.ge.s32.totalorder %s580_s12, 2  ;;  %s341_s5 = sand.u32 1, %s568_s9  }
  0xc1   : > { %s342_s6 = scalar_lea.sflag [#allocation3], %s341_s5 }
  0xc2   : > { %p480_p7 = pnand %p483_p4, %p641_p6 }
  0xc4   : > { %p481_p8 = pneg %p480_p7 }
  0xc6   : > { %563 = dma.done.wait (%p481_p8), %s342_s6, 1024  }
  0xc7   : > { %565 = vsyncadd (%p481_p8), %s342_s6, 4294966272  ;;  %p12_p9 = scmp.ge.s32.totalorder %s624_s15, 4   ;;  %s738_s9 = smov %s572_s10 }
  0xc8   : > { %s739_s10 = smov %s576_s11  ;;  %s740_s11 = smov %s635_s18 }
  0xc9   : > { %s741_s12 = smov %s624_s15  ;;  %14 = sbr.rel (!%p12_p9) target bundleno = 3 (0x3), region = 63 }
  0xce   :  { %348 = vsyncpa [#allocation3], 1 }
  0xcf   :  { %350 = vsyncpa [#allocation3 + $0x1], 1 }

</bundles_post_ra>
